<compile_context>
chip_gen: v6e
topology: v6e:2x2x1
jax: 0.10.0
libtpu: 0.0.40
codegen_flags: <defaults>
</compile_context>

<pallas_src>
from functools import partial

import jax
import jax.numpy as jnp
from jax.experimental import pallas as pl
from jax.experimental.pallas import tpu as pltpu


def _round_up(n: int, m: int) -> int:
    return ((n + m - 1) // m) * m


def simplenet_kernel(x_ref, w1_ref, b1_ref, w2_ref, b2_ref, o_ref):
    # fc1: (TB, D_in) @ (D_in, H_p) on the MXU, f32 accumulate.
    h = jnp.dot(x_ref[...], w1_ref[...], preferred_element_type=jnp.float32)
    # bias + ReLU in f32 on the VPU (padded H lanes stay exactly 0).
    h = jnp.maximum(h + b1_ref[...], 0.0)
    # fc2: cast activation back to bf16 for the MXU, accumulate in f32.
    y = jnp.dot(h.astype(w2_ref.dtype), w2_ref[...],
                preferred_element_type=jnp.float32)
    o_ref[...] = (y + b2_ref[...]).astype(o_ref.dtype)


def prepare_params(w1, b1, w2, b2):
    """One-time weight prep (hoisted out of the per-call hot path).

    w1: (D_in, H); b1: (1, H); w2: (H, D_out); b2: (1, D_out) — weights stored
    (in_features, out_features), i.e. transposed from PyTorch's Linear layout,
    so the kernel computes plain x @ W + b.  The hidden dim is zero-padded to
    the 128-lane width and matmul operands are cast to bf16; padded columns of
    w1 / rows of w2 / entries of b1 are exact zeros so results are unchanged.
    """
    D_in, H = w1.shape
    D_out = w2.shape[1]
    h_p = _round_up(H, 128)
    w1p = jnp.pad(w1.astype(jnp.bfloat16), ((0, 0), (0, h_p - H)))
    b1p = jnp.pad(b1.astype(jnp.float32).reshape(1, H), ((0, 0), (0, h_p - H)))
    w2p = jnp.pad(w2.astype(jnp.bfloat16), ((0, h_p - H), (0, 0)))
    b2p = b2.astype(jnp.float32).reshape(1, D_out)
    return w1p, b1p, w2p, b2p


@partial(jax.jit, static_argnames=("block_batch",))
def simplenet_forward(x, params, *, block_batch=2048):
    """x: (B, D_in) f32; params: output of prepare_params().  Returns (B, D_out) f32."""
    w1p, b1p, w2p, b2p = params
    B, D_in = x.shape
    h_p = w1p.shape[1]
    D_out = w2p.shape[1]

    # Pad only the batch dim (to the bf16 sublane tile / batch-tile size).
    b_p = _round_up(B, 16)
    if b_p > block_batch:
        tb = block_batch
        b_p = _round_up(b_p, tb)     # grid >= 2 steps -> both v7x TCs get work
    else:
        tb = b_p

    xp = jnp.pad(x.astype(jnp.bfloat16), ((0, b_p - B), (0, 0)))

    grid = (b_p // tb,)

    bytes_accessed = (xp.size * 2 + w1p.size * 2 + w2p.size * 2 +
                      b1p.size * 4 + b2p.size * 4 + b_p * D_out * 4)
    cost = pl.CostEstimate(
        flops=2 * b_p * (D_in * h_p + h_p * D_out),
        transcendentals=0,
        bytes_accessed=bytes_accessed,
    )

    out_padded = pl.pallas_call(
        simplenet_kernel,
        out_shape=jax.ShapeDtypeStruct((b_p, D_out), jnp.float32),
        grid=grid,
        in_specs=[
            # Activations: tiled over the batch grid, unpadded D_in (full dim).
            pl.BlockSpec((tb, D_in), lambda i: (i, 0)),
            # Weights / biases: same block every grid step -> VMEM-resident.
            pl.BlockSpec((D_in, h_p), lambda i: (0, 0)),
            pl.BlockSpec((1, h_p), lambda i: (0, 0)),
            pl.BlockSpec((h_p, D_out), lambda i: (0, 0)),
            pl.BlockSpec((1, D_out), lambda i: (0, 0)),
        ],
        # Unpadded D_out output block: 8x less HBM writeback than 128-lane f32.
        out_specs=pl.BlockSpec((tb, D_out), lambda i: (i, 0)),
        compiler_params=pltpu.CompilerParams(
            dimension_semantics=("parallel",),
        ),
        cost_estimate=cost,
    )(xp, w1p, b1p, w2p, b2p)

    # Padded batch rows of out_padded are NOT zero (relu(b1) @ w2 + b2); they
    # are sliced off here, so the returned result is exact.
    return out_padded[:B, :]


def init_params(key, input_dim, hidden_dim, output_dim):
    """Deterministic PyTorch-style Linear init: U(-1/sqrt(fan_in), 1/sqrt(fan_in))."""
    k1, k2, k3, k4 = jax.random.split(key, 4)
    bound1 = 1.0 / jnp.sqrt(input_dim)
    bound2 = 1.0 / jnp.sqrt(hidden_dim)
    w1 = jax.random.uniform(k1, (input_dim, hidden_dim), jnp.float32, -bound1, bound1)
    b1 = jax.random.uniform(k2, (1, hidden_dim), jnp.float32, -bound1, bound1)
    w2 = jax.random.uniform(k3, (hidden_dim, output_dim), jnp.float32, -bound2, bound2)
    b2 = jax.random.uniform(k4, (1, output_dim), jnp.float32, -bound2, bound2)
    return w1, b1, w2, b2


if __name__ == "__main__":
    # Small shapes consistent with the module's forward: x is (batch, input_dim).
    batch, input_dim, hidden_dim, output_dim = 8, 32, 64, 16

    key = jax.random.PRNGKey(0)
    kx, kp = jax.random.split(key)
    x = jax.random.normal(kx, (batch, input_dim), dtype=jnp.float32)
    w1, b1, w2, b2 = init_params(kp, input_dim, hidden_dim, output_dim)

    # One-time weight prep (pad hidden dim to 128 lanes, cast matmul operands
    # to bf16); only x handling happens per forward call.
    params = prepare_params(w1, b1, w2, b2)

    out = simplenet_forward(x, params)
    out = jax.block_until_ready(out)

    # Pure-JAX f32 reference of the same math (bf16 MXU operands in the kernel
    # => loosened tolerance vs. the f32 reference).
    ref = jnp.maximum(x @ w1 + b1, 0.0) @ w2 + b2
    assert out.shape == (batch, output_dim)
    assert jnp.allclose(out, ref, atol=2e-2, rtol=2e-2), (
        f"max abs err {jnp.max(jnp.abs(out - ref))}")

    print("KERNEL_OK")
</pallas_src>

<mosaic_0001>
module attributes {stable_mosaic.version = 11 : i64} {
  func.func @simplenet_kernel(%arg0: i32, %arg1: memref<16x32xbf16, #tpu.memory_space<vmem>>, %arg2: memref<32x128xbf16, #tpu.memory_space<vmem>>, %arg3: memref<1x128xf32, #tpu.memory_space<vmem>>, %arg4: memref<128x16xbf16, #tpu.memory_space<vmem>>, %arg5: memref<1x16xf32, #tpu.memory_space<vmem>>, %arg6: memref<16x16xf32, #tpu.memory_space<vmem>>) attributes {dimension_semantics = [#tpu.dimension_semantics<parallel>], iteration_bounds = array<i64: 1>, scalar_prefetch = 0 : i64, scratch_operands = 0 : i64, tpu.core_type = #tpu.core_type<tc>, window_params = [{transform_indices = @transform_0, window_bounds = array<i64: 16, 32>}, {pipeline_mode = #tpu.pipeline_mode<synchronous>, transform_indices = @transform_1, window_bounds = array<i64: 32, 128>}, {pipeline_mode = #tpu.pipeline_mode<synchronous>, transform_indices = @transform_2, window_bounds = array<i64: 1, 128>}, {pipeline_mode = #tpu.pipeline_mode<synchronous>, transform_indices = @transform_3, window_bounds = array<i64: 128, 16>}, {pipeline_mode = #tpu.pipeline_mode<synchronous>, transform_indices = @transform_4, window_bounds = array<i64: 1, 16>}, {transform_indices = @transform_5, window_bounds = array<i64: 16, 16>}]} {
    %c0 = arith.constant 0 : index
    %c0_0 = arith.constant 0 : index
    %0 = vector.load %arg1[%c0, %c0_0] : memref<16x32xbf16, #tpu.memory_space<vmem>>, vector<16x32xbf16>
    %c0_1 = arith.constant 0 : index
    %c0_2 = arith.constant 0 : index
    %1 = vector.load %arg2[%c0_1, %c0_2] : memref<32x128xbf16, #tpu.memory_space<vmem>>, vector<32x128xbf16>
    %cst = arith.constant dense<0.000000e+00> : vector<16x128xf32>
    %2 = tpu.matmul %0, %1, %cst {dimension_numbers = #tpu.dot_dimension_numbers<[1], [0], [0], [1], [0, 0, 1, 1], [], []>} : vector<16x32xbf16>, vector<32x128xbf16>, vector<16x128xf32> -> vector<16x128xf32>
    %c0_3 = arith.constant 0 : index
    %c0_4 = arith.constant 0 : index
    %3 = vector.load %arg3[%c0_3, %c0_4] : memref<1x128xf32, #tpu.memory_space<vmem>>, vector<1x128xf32>
    %4 = vector.broadcast %3 : vector<1x128xf32> to vector<16x128xf32>
    %5 = arith.addf %2, %4 : vector<16x128xf32>
    %cst_5 = arith.constant 0.000000e+00 : f32
    %6 = vector.broadcast %cst_5 : f32 to vector<16x128xf32>
    %7 = arith.maximumf %5, %6 : vector<16x128xf32>
    %8 = arith.truncf %7 : vector<16x128xf32> to vector<16x128xbf16>
    %c0_6 = arith.constant 0 : index
    %c0_7 = arith.constant 0 : index
    %9 = vector.load %arg4[%c0_6, %c0_7] : memref<128x16xbf16, #tpu.memory_space<vmem>>, vector<128x16xbf16>
    %cst_8 = arith.constant dense<0.000000e+00> : vector<16x16xf32>
    %10 = tpu.matmul %8, %9, %cst_8 {dimension_numbers = #tpu.dot_dimension_numbers<[1], [0], [0], [1], [0, 0, 1, 1], [], []>} : vector<16x128xbf16>, vector<128x16xbf16>, vector<16x16xf32> -> vector<16x16xf32>
    %c0_9 = arith.constant 0 : index
    %c0_10 = arith.constant 0 : index
    %11 = vector.load %arg5[%c0_9, %c0_10] : memref<1x16xf32, #tpu.memory_space<vmem>>, vector<1x16xf32>
    %12 = vector.broadcast %11 : vector<1x16xf32> to vector<16x16xf32>
    %13 = arith.addf %10, %12 : vector<16x16xf32>
    %c0_11 = arith.constant 0 : index
    %c0_12 = arith.constant 0 : index
    %14 = vector.load %arg6[%c0_11, %c0_12] : memref<16x16xf32, #tpu.memory_space<vmem>>, vector<16x16xf32>
    tpu.vector_store %arg6[%c0_11, %c0_12], %13 {strides = array<i32>} : memref<16x16xf32, #tpu.memory_space<vmem>>, vector<16x16xf32>,
    return
  }
  func.func @transform_0(%arg0: i32) -> (i32, i32) {
    %c0_i32 = arith.constant 0 : i32
    %c0_i32_0 = arith.constant 0 : i32
    return %arg0, %c0_i32 : i32, i32
  }
  func.func @transform_1(%arg0: i32) -> (i32, i32) {
    %c0_i32 = arith.constant 0 : i32
    %c0_i32_0 = arith.constant 0 : i32
    %c0_i32_1 = arith.constant 0 : i32
    return %c0_i32, %c0_i32_0 : i32, i32
  }
  func.func @transform_2(%arg0: i32) -> (i32, i32) {
    %c0_i32 = arith.constant 0 : i32
    %c0_i32_0 = arith.constant 0 : i32
    %c0_i32_1 = arith.constant 0 : i32
    return %c0_i32, %c0_i32_0 : i32, i32
  }
  func.func @transform_3(%arg0: i32) -> (i32, i32) {
    %c0_i32 = arith.constant 0 : i32
    %c0_i32_0 = arith.constant 0 : i32
    %c0_i32_1 = arith.constant 0 : i32
    return %c0_i32, %c0_i32_0 : i32, i32
  }
  func.func @transform_4(%arg0: i32) -> (i32, i32) {
    %c0_i32 = arith.constant 0 : i32
    %c0_i32_0 = arith.constant 0 : i32
    %c0_i32_1 = arith.constant 0 : i32
    return %c0_i32, %c0_i32_0 : i32, i32
  }
  func.func @transform_5(%arg0: i32) -> (i32, i32) {
    %c0_i32 = arith.constant 0 : i32
    %c0_i32_0 = arith.constant 0 : i32
    return %arg0, %c0_i32 : i32, i32
  }
}

</mosaic_0001>

<bundles_post_ra>
// kernel: simplenet_forward.1
= control target key start
LH: loop header
LB: loop body
LE: loop exit
PB: predicated region body
PF: predicated region fallthrough
CT: control target
= control target key end

     0   :  { %v285_v0 = vmov 0.0   ;;  %vm286_vm0 = vmmov 0   ;;  %vm51_vm1 = vcmask 261120   ;;  %vm211_vm2 = vcmask 130048   ;;  %s362_s1 = inlined_call_operand.vmem [shape: bf16[32,128], index: 1, kind: input, shape index: {}]   ;;  %s363_s3 = inlined_call_operand.vmem [shape: bf16[128,16], index: 3, kind: input, shape index: {}]   ;;  %s364_s0 = inlined_call_operand.vmem [shape: bf16[16,32], index: 0, kind: input, shape index: {}]   ;;  %s365_s2 = inlined_call_operand.vmem [shape: f32[1,128], index: 2, kind: input, shape index: {}]   ;;  %s366_s4 = inlined_call_operand.vmem [shape: f32[1,16], index: 4, kind: input, shape index: {}]   ;;  %s367_s5 = inlined_call_operand.vmem [shape: f32[16,16], index: 5, kind: output, shape index: {}]  }
   0x1   :  { %244 = vmatprep.subr.bf16.mxu0 %v285_v0  ;;  %v274_v1 = vld [vmem:[%s362_s1 + $0x8] sm:$0xff]   ;;  %248 = vmatprep.mubr.msk.bf16.mxu0 %vm286_vm0, %v285_v0  ;;  %v275_v2 = vld [vmem:[%s362_s1] sm:$0xff]   ;;  %v277_v3 = vld [vmem:[%s363_s3 + $0x38] sm:$0xff]  }
   0x2   :  { %252 = vmatprep.subr.bf16.mxu1 %v285_v0  ;;  %268 = vmatprep.mubr.msk.bf16.mxu1 %vm286_vm0, %v285_v0  ;;  %v276_v4 = vld [vmem:[%s364_s0] sm:$0xff]   ;;  %v278_v5 = vld [vmem:[%s363_s3 + $0x30] sm:$0xff]   ;;  %v279_v6 = vld [vmem:[%s363_s3 + $0x28] sm:$0xff]  }
   0x3   :  { %245 = vmatpush3.bf16.msra.mxu0 %v274_v1  ;;  %253 = vmatpush3.bf16.msra.mxu1 %v277_v3  ;;  %v280_v7 = vld [vmem:[%s363_s3 + $0x20] sm:$0xff]   ;;  %v281_v8 = vld [vmem:[%s363_s3 + $0x18] sm:$0xff]   ;;  %v282_v9 = vld [vmem:[%s363_s3 + $0x10] sm:$0xff]  }
   0x4   :  { %246 = vmatprep.subr.bf16.mxu0 %v285_v0  ;;  %254 = vmatprep.subr.bf16.mxu1 %v285_v0  ;;  %v283_v10 = vld [vmem:[%s363_s3 + $0x8] sm:$0xff]   ;;  %v284_v11 = vld [vmem:[%s363_s3] sm:$0xff]  }
   0x5   :  { %v218_v12 = vld [vmem:[%s365_s2] ss:$0 sm:$0xff] }
   0x6   :  { %v223_v22 = vld [vmem:[%s366_s4] ss:$0 sm:$0xff] }
   0x7   :  { %247 = vmatpush3.bf16.msra.mxu0 %v275_v2  ;;  %255 = vmatpush3.bf16.msra.mxu1 %v278_v5 }
   0x8   :  { %256 = vmatprep.subr.bf16.mxu1 %v285_v0 }
   0xa   :  { %249 = vmatmul.mubr.msk.bf16.vlgmr.msra.gmra.mxu0 %vm51_vm1, %v276_v4 }
   0xb   :  { %257 = vmatpush3.bf16.msra.mxu1 %v279_v6 }
   0xc   :  { %258 = vmatprep.subr.bf16.mxu1 %v285_v0 }
   0xf   :  { %259 = vmatpush3.bf16.msra.mxu1 %v280_v7 }
  0x10   :  { %260 = vmatprep.subr.bf16.mxu1 %v285_v0 }
  0x13   :  { %261 = vmatpush3.bf16.msra.mxu1 %v281_v8 }
  0x14   :  { %262 = vmatprep.subr.bf16.mxu1 %v285_v0 }
  0x17   :  { %263 = vmatpush3.bf16.msra.mxu1 %v282_v9 }
  0x18   :  { %264 = vmatprep.subr.bf16.mxu1 %v285_v0 }
  0x1b   :  { %265 = vmatpush3.bf16.msra.mxu1 %v283_v10 }
  0x1c   :  { %266 = vmatprep.subr.bf16.mxu1 %v285_v0 }
  0x1f   :  { %267 = vmatpush3.bf16.msra.mxu1 %v284_v11 }
  0xca   :  { %v89_v13 = vpop.f32.mrf.mxu0 }
  0xcb   :  { %v90_v15 = vadd.f32 %v218_v12, %v89_v13 }
  0xcc   :  { %v250_v14 = vpop.f32.mrf.mxu0 }
  0xcd   :  { %v96_v19 = vmax.f32 %v90_v15, 0.0 }
  0xce   :  { %v92_v16 = vpop.f32.mrf.mxu0 }
  0xcf   :  { %v93_v17 = vadd.f32 %v218_v12, %v92_v16 }
  0xd0   :  { %v251_v18 = vpop.f32.mrf.mxu0 }
  0xd1   :  { %v97_v20 = vmax.f32 %v93_v17, 0.0 }
  0xd3   :  { %v98_v21 = vpack.c.bf16 %v97_v20, %v96_v19 }
  0xd5   :  { %269 = vmatmul.mubr.bf16.vlgmr.msra.gmra.mxu1 %v98_v21 }
 0x195   :  { %v204_v23 = vpop.f32.mrf.mxu1 }
 0x196   :  { %v205_v24 = vadd.f32 %v223_v22, %v204_v23 }
 0x197   :  { %v270_v25 = vpop.f32.mrf.mxu1 }
 0x198   :  { %212 = vst.msk [vmem:[%s367_s5] sm:$0xff] %vm211_vm2, %v205_v24 }
 0x199   :  { %v207_v26 = vpop.f32.mrf.mxu1 }
 0x19a   :  { %v208_v27 = vadd.f32 %v223_v22, %v207_v26 }
 0x19b   :  { %v271_v28 = vpop.f32.mrf.mxu1 }
 0x19c   :  { %213 = vst.msk [vmem:[%s367_s5 + $0x8] sm:$0xff] %vm211_vm2, %v208_v27 }

</bundles_post_ra>
